<compile_context>
chip_gen: v7x
topology: tpu7x:2x2x1
jax: 0.10.0
libtpu: 0.0.40
codegen_flags: <defaults>
</compile_context>

<pallas_src>
import jax
import jax.numpy as jnp
from jax.experimental import pallas as pl
from jax.experimental.pallas import tpu as pltpu


# ----------------------------- kernel ---------------------------------------


def _make_label_smoothing_kernel(smoothing, num_classes, n_rows, tile_n):
    confidence = 1.0 - smoothing
    off_value = smoothing / (num_classes - 1)

    def kernel(pred_ref, target_ref, out_ref):
        pred = pred_ref[...].astype(jnp.float32)             # (tile_n, C)
        tgt = target_ref[...]                                 # (tile_n, 1) int32

        # log_softmax normalizer (max-shifted): logZ = m + log(sum(exp(pred-m)))
        m = jnp.max(pred, axis=-1, keepdims=True)             # (tile_n, 1)
        lse = jnp.log(jnp.sum(jnp.exp(pred - m), axis=-1, keepdims=True))
        log_z = m + lse                                        # (tile_n, 1)

        # Fused weighted reduction.  Since sum_c(w_c) == 1 exactly,
        #   row_loss = -sum_c w_c*(pred_c - logZ) = logZ - sum_c(w_c * pred_c)
        col = jax.lax.broadcasted_iota(jnp.int32, pred.shape, 1)
        hit = col == tgt
        if off_value == 0.0:
            # Plain cross entropy: w_c = [c == target].
            wsum = jnp.sum(jnp.where(hit, pred, 0.0), axis=-1, keepdims=True)
        else:
            w = jnp.where(hit, confidence, off_value)
            wsum = jnp.sum(w * pred, axis=-1, keepdims=True)
        row_loss = log_z - wsum                                # (tile_n, 1)

        # Mask padded tail rows (global row index >= n_rows contributes 0).
        # NOTE: relies on the wrapper padding pred with FINITE zeros so logZ
        # of padded rows stays finite; the mask then zeroes their contribution.
        row0 = pl.program_id(0) * tile_n
        local = jax.lax.broadcasted_iota(jnp.int32, (tile_n, 1), 0)
        valid = (row0 + local) < n_rows
        row_loss = jnp.where(valid, row_loss, 0.0)

        # Per-tile UNscaled partial sum; the wrapper scales by 1/N once.
        out_ref[...] = jnp.sum(row_loss, axis=0, keepdims=True).reshape(1, 1, 1)

    return kernel


# --------------------------- tiling helpers ----------------------------------


def _sublane_multiple(dtype):
    itemsize = jnp.dtype(dtype).itemsize
    if itemsize >= 4:
        return 8
    if itemsize == 2:
        return 16
    return 32


def _vmem_limit_bytes():
    """Per-chip scoped-VMEM limit: ~75% of physical, capped at 96 MiB."""
    try:
        phys = pltpu.get_tpu_info().vmem_capacity_bytes
    except Exception:
        phys = 64 * 1024 * 1024  # conservative (v7x per-TC) fallback
    return int(min(phys * 3 // 4, 96 * 1024 * 1024))


def _choose_tile_n(n, c, in_itemsize, sublane_mult, vmem_limit):
    """Largest row tile whose real working set fits the VMEM budget.

    Working set per tile row ~= C * (2 * in_itemsize            # double-buffered input DMA
                                     + 4 * 4)                    # ~4 full-C f32 temporaries
    (f32 upcast, exp(pred - m), iota/compare, weighted product).
    """
    bytes_per_row = c * (2 * in_itemsize + 4 * 4)
    budget = int(vmem_limit * 0.6)          # slack for compiler scratch/outputs
    t = budget // max(1, bytes_per_row)
    t = max(sublane_mult, (t // sublane_mult) * sublane_mult)

    n_pad = -(-n // sublane_mult) * sublane_mult
    t = min(t, n_pad)

    # Force >= 2 tiles when the batch allows, so the "parallel" grid axis can
    # shard across both TensorCores on v7x megacore (cost: one ~0.35us step).
    if t >= n_pad and n_pad >= 2 * sublane_mult:
        half = n_pad // 2
        t = -(-half // sublane_mult) * sublane_mult
    return t


# ------------------------------ wrapper --------------------------------------


def label_smoothing_loss(pred, target, *, classes, smoothing=0.0, tile_n=None):
    """pred: (N, C) float, target: (N,) int. Returns scalar float32 loss."""
    n, c = pred.shape
    assert c == classes
    assert classes > 1, "LabelSmoothingLoss requires classes > 1"

    sub = _sublane_multiple(pred.dtype)
    vmem_limit = _vmem_limit_bytes()
    if tile_n is None:
        tile_n = _choose_tile_n(n, c, jnp.dtype(pred.dtype).itemsize, sub,
                                vmem_limit)
    tile_n = max(sub, (int(tile_n) // sub) * sub)

    num_tiles = -(-n // tile_n)
    n_pad = num_tiles * tile_n
    if n_pad != n:
        # Padding MUST be finite (zeros): padded rows' logZ stays finite and
        # the in-kernel row mask zeroes their loss contribution.
        pred = jnp.pad(pred, ((0, n_pad - n), (0, 0)))
        target = jnp.pad(target, (0, n_pad - n))
    target2d = target.astype(jnp.int32).reshape(n_pad, 1)

    partials = pl.pallas_call(
        _make_label_smoothing_kernel(smoothing, classes, n, tile_n),
        out_shape=jax.ShapeDtypeStruct((num_tiles, 1, 1), jnp.float32),
        grid=(num_tiles,),
        in_specs=[
            pl.BlockSpec((tile_n, c), lambda i: (i, 0)),   # pred row tile, full C
            pl.BlockSpec((tile_n, 1), lambda i: (i, 0)),   # target row tile
        ],
        out_specs=pl.BlockSpec((1, 1, 1), lambda i: (i, 0, 0)),
        compiler_params=pltpu.CompilerParams(
            dimension_semantics=("parallel",),
            vmem_limit_bytes=vmem_limit),
    )(pred, target2d)

    # Tiny final reduction over per-tile partial sums; scale by 1/N once.
    return jnp.sum(partials) * (1.0 / n)


# ------------------------------ reference ------------------------------------


def _reference(pred, target, classes, smoothing):
    logp = jax.nn.log_softmax(pred.astype(jnp.float32), axis=-1)
    true_dist = jnp.full_like(logp, smoothing / (classes - 1))
    true_dist = true_dist.at[jnp.arange(pred.shape[0]), target].set(1.0 - smoothing)
    return jnp.mean(jnp.sum(-true_dist * logp, axis=-1))


if __name__ == "__main__":
    key = jax.random.PRNGKey(0)
    k1, k2, k3, k4, k5, k6 = jax.random.split(key, 6)

    # Case 1: small f32 batch, smoothing=0.1 (single tile).
    N1, C1 = 8, 32
    pred1 = jax.random.normal(k1, (N1, C1), dtype=jnp.float32)
    target1 = jax.random.randint(k2, (N1,), 0, C1, dtype=jnp.int32)
    loss1 = jax.block_until_ready(
        label_smoothing_loss(pred1, target1, classes=C1, smoothing=0.1))
    ref1 = _reference(pred1, target1, C1, 0.1)
    assert jnp.allclose(loss1, ref1, atol=1e-5, rtol=1e-5), (loss1, ref1)

    # Case 2: ragged f32 batch + smoothing=0 (plain-CE specialization,
    # exercises the forced 2-tile split and tail-row masking).
    N2, C2 = 13, 160
    pred2 = jax.random.normal(k3, (N2, C2), dtype=jnp.float32)
    target2 = jax.random.randint(k4, (N2,), 0, C2, dtype=jnp.int32)
    loss2 = jax.block_until_ready(
        label_smoothing_loss(pred2, target2, classes=C2, smoothing=0.0))
    ref2 = _reference(pred2, target2, C2, 0.0)
    assert jnp.allclose(loss2, ref2, atol=1e-5, rtol=1e-5), (loss2, ref2)

    # Case 3: bf16 input (exercises the 16-row sublane rounding), smoothing=0.1.
    N3, C3 = 24, 128
    pred3 = jax.random.normal(k5, (N3, C3), dtype=jnp.float32).astype(jnp.bfloat16)
    target3 = jax.random.randint(k6, (N3,), 0, C3, dtype=jnp.int32)
    loss3 = jax.block_until_ready(
        label_smoothing_loss(pred3, target3, classes=C3, smoothing=0.1))
    ref3 = _reference(pred3, target3, C3, 0.1)
    assert jnp.allclose(loss3, ref3, atol=1e-4, rtol=1e-4), (loss3, ref3)

    print("KERNEL_OK")
</pallas_src>

<mosaic_0001>
module attributes {stable_mosaic.version = 11 : i64} {
  func.func @kernel(%arg0: i32, %arg1: memref<8x32xf32, #tpu.memory_space<vmem>>, %arg2: memref<8x1xi32, #tpu.memory_space<vmem>>, %arg3: memref<1x1x1xf32, #tpu.memory_space<vmem>>) attributes {dimension_semantics = [#tpu.dimension_semantics<parallel>], iteration_bounds = array<i64: 1>, scalar_prefetch = 0 : i64, scratch_operands = 0 : i64, tpu.core_type = #tpu.core_type<tc>, window_params = [{transform_indices = @transform_0, window_bounds = array<i64: 8, 32>}, {transform_indices = @transform_1, window_bounds = array<i64: 8, 1>}, {transform_indices = @transform_2, window_bounds = array<i64: 1, 1, 1>}]} {
    %c0 = arith.constant 0 : index
    %c0_0 = arith.constant 0 : index
    %0 = vector.load %arg1[%c0, %c0_0] : memref<8x32xf32, #tpu.memory_space<vmem>>, vector<8x32xf32>
    %c0_1 = arith.constant 0 : index
    %c0_2 = arith.constant 0 : index
    %1 = vector.load %arg2[%c0_1, %c0_2] : memref<8x1xi32, #tpu.memory_space<vmem>>, vector<8x1xi32>
    %cst = arith.constant dense<0xFF800000> : vector<8xf32>
    %2 = vector.multi_reduction <maximumf>, %0, %cst [1] : vector<8x32xf32> to vector<8xf32>
    %3 = vector.shape_cast %2 : vector<8xf32> to vector<8x1xf32>
    %4 = vector.broadcast %3 : vector<8x1xf32> to vector<8x32xf32>
    %5 = arith.subf %0, %4 : vector<8x32xf32>
    %6 = math.exp %5 : vector<8x32xf32>
    %cst_3 = arith.constant dense<0.000000e+00> : vector<8xf32>
    %7 = vector.multi_reduction <add>, %6, %cst_3 [1] : vector<8x32xf32> to vector<8xf32>
    %8 = vector.shape_cast %7 : vector<8xf32> to vector<8x1xf32>
    %9 = math.log %8 : vector<8x1xf32>
    %10 = arith.addf %3, %9 : vector<8x1xf32>
    %11 = tpu.iota {dimensions = array<i32: 1>} : vector<8x32xi32>
    %12 = vector.broadcast %1 : vector<8x1xi32> to vector<8x32xi32>
    %13 = arith.cmpi eq, %11, %12 : vector<8x32xi32>
    %cst_4 = arith.constant 0.899999976 : f32
    %cst_5 = arith.constant 0.0032258064 : f32
    %14 = vector.broadcast %cst_4 : f32 to vector<8x32xf32>
    %15 = vector.broadcast %cst_5 : f32 to vector<8x32xf32>
    %16 = arith.select %13, %14, %15 : vector<8x32xi1>, vector<8x32xf32>
    %17 = arith.mulf %16, %0 : vector<8x32xf32>
    %cst_6 = arith.constant dense<0.000000e+00> : vector<8xf32>
    %18 = vector.multi_reduction <add>, %17, %cst_6 [1] : vector<8x32xf32> to vector<8xf32>
    %19 = vector.shape_cast %18 : vector<8xf32> to vector<8x1xf32>
    %20 = arith.subf %10, %19 : vector<8x1xf32>
    %c8_i32 = arith.constant 8 : i32
    %21 = arith.muli %arg0, %c8_i32 : i32
    %22 = tpu.iota {dimensions = array<i32: 0>} : vector<8x1xi32>
    %23 = vector.broadcast %21 : i32 to vector<8x1xi32>
    %24 = arith.addi %23, %22 : vector<8x1xi32>
    %c8_i32_7 = arith.constant 8 : i32
    %25 = vector.broadcast %c8_i32_7 : i32 to vector<8x1xi32>
    %26 = arith.cmpi slt, %24, %25 : vector<8x1xi32>
    %cst_8 = arith.constant 0.000000e+00 : f32
    %27 = vector.broadcast %cst_8 : f32 to vector<8x1xf32>
    %28 = arith.select %26, %20, %27 : vector<8x1xi1>, vector<8x1xf32>
    %cst_9 = arith.constant dense<0.000000e+00> : vector<1xf32>
    %29 = vector.multi_reduction <add>, %28, %cst_9 [0] : vector<8x1xf32> to vector<1xf32>
    %30 = vector.shape_cast %29 : vector<1xf32> to vector<1x1xf32>
    %31 = vector.shape_cast %30 : vector<1x1xf32> to vector<1x1x1xf32>
    %c0_10 = arith.constant 0 : index
    %c0_11 = arith.constant 0 : index
    %c0_12 = arith.constant 0 : index
    %32 = vector.load %arg3[%c0_10, %c0_11, %c0_12] : memref<1x1x1xf32, #tpu.memory_space<vmem>>, vector<1x1x1xf32>
    tpu.vector_store %arg3[%c0_10, %c0_11, %c0_12], %31 {strides = array<i32>} : memref<1x1x1xf32, #tpu.memory_space<vmem>>, vector<1x1x1xf32>,
    return
  }
  func.func @transform_0(%arg0: i32) -> (i32, i32) {
    %c0_i32 = arith.constant 0 : i32
    %c0_i32_0 = arith.constant 0 : i32
    return %arg0, %c0_i32 : i32, i32
  }
  func.func @transform_1(%arg0: i32) -> (i32, i32) {
    %c0_i32 = arith.constant 0 : i32
    %c0_i32_0 = arith.constant 0 : i32
    return %arg0, %c0_i32 : i32, i32
  }
  func.func @transform_2(%arg0: i32) -> (i32, i32, i32) {
    %c0_i32 = arith.constant 0 : i32
    %c0_i32_0 = arith.constant 0 : i32
    %c0_i32_1 = arith.constant 0 : i32
    return %arg0, %c0_i32, %c0_i32_0 : i32, i32, i32
  }
}

</mosaic_0001>

<bundles_post_ra>
// kernel: tpu_custom_call.1
= control target key start
LH: loop header
LB: loop body
LE: loop exit
PB: predicated region body
PF: predicated region fallthrough
CT: control target
= control target key end

     0   :  { %vm14_vm0 = vcmask 261120   ;;  %s139_s0 = inlined_call_operand.vmem [shape: f32[8,32], index: 0, kind: input, shape index: {}]   ;;  %s140_s1 = inlined_call_operand.vmem [shape: s32[8,1], index: 1, kind: input, shape index: {}]   ;;  %s141_s2 = inlined_call_operand.hbm [shape: f32[1,1,1], index: 2, kind: output, shape index: {}]  }
   0x1   :  { %v12_v0 = vld [vmem:[%s139_s0] sm:$0xff] }
   0x2   :  { %7 = vsyncpa [#allocation3], 0  ;;  %v15_v1 = vsel %vm14_vm0, %v12_v0, -inf  ;;  %v100_v2 = vmov 0   ;;  %v13_v3 = vld [vmem:[%s140_s1] sm:$0xff]  ;;  %v27_v6 = vlaneseq  ;;  %s102_s0 = smov [#allocation2]  }
   0x3   :  { %71 = vset.pattern.permute.xlu0 %v100_v2  ;;  %v101_v10 = vmov 0.0032258064   ;;  %s60_s1 = sshll.u32 %s102_s0, 4  ;;  %vm52_vm2 = vcmask 0   ;;  %s61_s1 = int_to_ptr.vmem [resolvable:$true] %s60_s1 }
   0x4   :  { %16 = vmax.xlane.f32.xlu0 %v15_v1  ;;  %v28_v8 = vand.u32 127, %v27_v6  ;;  %s76_s13 = scalar_lea.vmem %s61_s1, 16  ;;  %s80_s14 = scalar_lea.vmem %s61_s1, 32 }
   0x5   :  { %p77_p0 = scmp.ne.s32.totalorder %s61_s1, %s76_s13  ;;  %p81_p1 = scmp.lt.s32.totalorder %s61_s1, %s61_s1 }
   0x6   :  { %p82_p2 = scmp.lt.s32.totalorder %s80_s14, %s76_s13 }
   0x8   :  { %p83_p3 = por %p82_p2, %p81_p1 }
   0xa   :  { %p84_p4 = pnand %p83_p3, %p77_p0 }
  0x1a   :  { %30 = vperm.xlu0 %71, %v13_v3  }
  0x91   :  { %v17_v4 = vpop.xlane.xlu0 %16 }
  0x92   :  { %v18_v5 = vsub.f32 %v12_v0, %v17_v4 }
  0x94   :  { %v19_v7 = vmul.f32 1.442695, %v18_v5 }
  0x96   :  { %72 = vpow2.f32 %v19_v7 }
  0x99   :  { %v31_v9 = vpop.permute.xlu0 %30 }
  0x9a   :  { %vm32_vm1 = vcmp.eq.s32.totalorder %v28_v8, %v31_v9 }
  0x9b   :  { %v33_v11 = vsel %vm32_vm1, 0.9, %v101_v10 }
  0x9c   :  { %v34_v12 = vmul.f32 %v33_v11, %v12_v0 }
  0x9e   :  { %v35_v15 = vsel %vm14_vm0, %v34_v12, 0.0 }
  0xa0   :  { %v73_v13 = vpop.eup %72 }
  0xa1   :  { %v21_v14 = vsel %vm14_vm0, %v73_v13, 0.0 }
  0xa2   :  { %22 = vadd.xlane.f32.xlu1 %v21_v14 }
  0xa6   :  { %36 = vadd.xlane.f32.xlu1 %v35_v15 }
 0x12f   :  { %v23_v16 = vpop.xlane.xlu1 %22 }
 0x130   :  { %74 = vlog2.f32 %v23_v16 }
 0x133   :  { %v37_v19 = vpop.xlane.xlu1 %36 }
 0x13a   :  { %v75_v17 = vpop.eup %74 }
 0x13b   :  { %v25_v18 = vmul.f32 0.6931472, %v75_v17 }
 0x13d   :  { %v26_v20 = vadd.f32 %v25_v18, %v17_v4 }
 0x13f   :  { %v38_v21 = vsub.f32 %v26_v20, %v37_v19 }
 0x141   :  { %v46_v22 = vrot.slane %v38_v21, 4 }
 0x143   :  { %v47_v23 = vadd.f32 %v46_v22, %v38_v21 }
 0x145   :  { %v48_v24 = vrot.slane %v47_v23, 2 }
 0x147   :  { %v49_v25 = vadd.f32 %v48_v24, %v47_v23 }
 0x149   :  { %v50_v26 = vrot.slane %v49_v25, 1 }
 0x14b   :  { %v51_v27 = vadd.f32 %v50_v26, %v49_v25 }
 0x14d   :  { %53 = vst.msk [vmem:[#allocation2] sm:$0x1] %vm52_vm2, %v51_v27 }
 0x14e   :  { %87 = shalt.err (!%p84_p4)
}
 0x14f   :  { %s88_s17 = scalar_lea.hbm %s141_s2, 16 }
 0x150   :  { %p89_p5 = scmp.ne.s32.totalorder %s141_s2, %s88_s17  ;;  %p92_p6 = scmp.lt.u32.totalorder %s88_s17, %s141_s2 }
 0x152   :  { %p94_p7 = pnand %p92_p6, %p89_p5 }
 0x154   :  { %97 = shalt.err (!%p94_p7)
}
 0x155   :  { %63 = dma.vmem_to_hbm [thread:$0]  %s61_s1, 16, %s141_s2, [#allocation3]  }
 0x156   :  { %98 = dma.done.wait [#allocation3], 16  }
 0x157   :  { %99 = vsyncadd [#allocation3], 4294967280 }
 0x158   :  { %67 = vsyncpa [#allocation3], 1 }

</bundles_post_ra>
